<compile_context>
chip_gen: v5e
topology: v5e:2x2
jax: 0.10.0
libtpu: 0.0.40
codegen_flags: <defaults>
</compile_context>

<pallas_src>
import jax
import jax.numpy as jnp
from jax.experimental import pallas as pl
from jax.experimental.pallas import tpu as pltpu


def _round_up(x, m):
    return ((x + m - 1) // m) * m


def _conv1x1_kernel_lane_dense(x_ref, w_ref, b_ref, o_ref):
    # x_ref: (C, block_hw)     channel-major pixel slab (read straight from NCHW)
    # w_ref: (CO, C)           1x1-conv weight, VMEM resident across the grid
    # b_ref: (CO, 1)           bias, f32
    # o_ref: (block_hw*CO,)    lane-dense, flattened NHWC output tile
    acc = jnp.dot(w_ref[...], x_ref[...],
                  preferred_element_type=jnp.float32)            # (CO, block_hw) f32
    t = jnp.transpose((acc + b_ref[...]).astype(o_ref.dtype), (1, 0))  # (block_hw, CO)
    # Relayout to the row-major (pixel, CO) flat order: makes the VMEM output
    # buffer dense and the writeback DMA fully contiguous.  Pure in-kernel
    # filler given the huge compute slack of this mem-bound kernel.
    o_ref[...] = t.reshape(o_ref.shape)


def _conv1x1_kernel_lane_padded(x_ref, w_ref, b_ref, o_ref):
    # Fallback layout: o_ref is (block_hw, CO).  CO<128 -> masked stores and a
    # lane-padded output buffer, but guaranteed to lower (this is the layout of
    # the previously validated kernel).
    acc = jnp.dot(w_ref[...], x_ref[...],
                  preferred_element_type=jnp.float32)            # (CO, block_hw) f32
    o_ref[...] = jnp.transpose((acc + b_ref[...]).astype(o_ref.dtype), (1, 0))


def landmark_head_forward(x_nchw, weight, bias, num_anchors=3,
                          block_hw=8192, lane_dense_out=True):
    """Forward pass of LandmarkHead.

    x_nchw : (N, C, H, W)     activations (f32 or bf16)
    weight : (A*10, C, 1, 1)  conv1x1 weight
    bias   : (A*10,)          conv1x1 bias
    returns: (N, H*W*A, 10)   == conv1x1 -> permute(0,2,3,1) -> view
    """
    N, C, H, W = x_nchw.shape
    CO = num_anchors * 10
    assert weight.shape == (CO, C, 1, 1)
    assert bias.shape == (CO,)

    hw = H * W
    dtype = x_nchw.dtype

    # Lane-aligned pixel tile, clamped to the (128-rounded) map size.  8192 is a
    # good default on v6e/v7x; it is also fine on v5e given the explicit
    # vmem_limit_bytes below (per-generation knob if needed).
    block_hw = min(_round_up(block_hw, 128), _round_up(hw, 128))
    # v7x guard: keep at least 2 grid steps so both TensorCores get work and the
    # DMA pipeline has something to overlap (avoids grid collapsing to (1, 1)).
    if N * pl.cdiv(hw, block_hw) < 2 and hw > 128:
        block_hw = _round_up(pl.cdiv(hw, 2), 128)

    grid = (N, pl.cdiv(hw, block_hw))

    x = x_nchw.reshape(N, C, hw)                     # free view of NCHW (no HBM pass)
    w2d = weight.reshape(CO, C).astype(dtype)        # tiny; matches activation dtype
    b2d = bias.reshape(CO, 1).astype(jnp.float32)    # epilogue stays f32

    itemsize = jnp.dtype(dtype).itemsize
    cost = pl.CostEstimate(
        flops=int(2 * N * hw * C * CO),
        transcendentals=0,
        bytes_accessed=int(N * hw * C * itemsize          # read x
                           + CO * C * itemsize + CO * 4   # weight + bias
                           + N * hw * CO * itemsize),     # write out
    )

    in_specs = [
        # (C, block_hw) channel-major pixel slab, read straight from NCHW.
        pl.BlockSpec((None, C, block_hw), lambda n, j: (n, 0, j)),
        # Weight / bias: constant block index -> stays resident, no re-DMA.
        pl.BlockSpec((CO, C), lambda n, j: (0, 0)),
        pl.BlockSpec((CO, 1), lambda n, j: (0, 0)),
    ]
    compiler_params = pltpu.CompilerParams(
        dimension_semantics=("parallel", "parallel"),
        vmem_limit_bytes=32 * 1024 * 1024,   # v5e default scoped VMEM is only 16 MiB
    )

    def run(lane_dense):
        if lane_dense:
            kernel = _conv1x1_kernel_lane_dense
            out_shape = jax.ShapeDtypeStruct((N, hw * CO), dtype)
            out_specs = pl.BlockSpec((None, block_hw * CO), lambda n, j: (n, j))
        else:
            kernel = _conv1x1_kernel_lane_padded
            out_shape = jax.ShapeDtypeStruct((N, hw, CO), dtype)
            out_specs = pl.BlockSpec((None, block_hw, CO), lambda n, j: (n, j, 0))
        out = pl.pallas_call(
            kernel,
            out_shape=out_shape,
            grid_spec=pltpu.PrefetchScalarGridSpec(
                num_scalar_prefetch=0,
                grid=grid,
                in_specs=in_specs,
                out_specs=out_specs,
            ),
            compiler_params=compiler_params,
            cost_estimate=cost,
        )(x, w2d, b2d)
        # Row-major (pixel, CO) memory order == PyTorch permute(0,2,3,1).view(N,-1,10),
        # so this reshape is free.
        return out.reshape(N, hw * num_anchors, 10)

    if lane_dense_out:
        try:
            return run(lane_dense=True)
        except Exception:
            # TODO(synk): drop this fallback once the (block_hw, CO) -> flat in-kernel
            # relayout is confirmed to lower on all deployed Mosaic versions.  (The
            # guard only works for eager calls; under an outer jit pass
            # lane_dense_out=False explicitly if lowering fails.)
            pass
    return run(lane_dense=False)


if __name__ == "__main__":
    # Small shapes consistent with the module: inchannels=32, num_anchors=3.
    N, C, H, W = 2, 32, 16, 16
    num_anchors = 3
    CO = num_anchors * 10

    key = jax.random.PRNGKey(0)
    kx, kw, kb = jax.random.split(key, 3)
    x = jax.random.normal(kx, (N, C, H, W), dtype=jnp.float32)
    weight = jax.random.normal(kw, (CO, C, 1, 1), dtype=jnp.float32) * 0.05
    bias = jax.random.normal(kb, (CO,), dtype=jnp.float32) * 0.05

    def torch_ref(xa, wa, ba):
        y = jnp.einsum("nchw,oc->nhwo", xa, wa.reshape(CO, C)) + ba
        return y.reshape(xa.shape[0], -1, 10)

    # ---- f32 path (matches PyTorch default dtype) ----
    out = jax.block_until_ready(landmark_head_forward(x, weight, bias, num_anchors=num_anchors))
    ref = torch_ref(x, weight, bias)
    assert out.shape == (N, H * W * num_anchors, 10)
    assert out.dtype == x.dtype
    assert jnp.allclose(out, ref, atol=1e-3, rtol=1e-3)

    # ---- non-divisible spatial size: exercises cdiv-grid boundary masking
    #      (no host-side pad or slice passes anymore) ----
    x2 = jax.random.normal(kx, (1, C, 13, 13), dtype=jnp.float32)
    out2 = jax.block_until_ready(landmark_head_forward(x2, weight, bias, num_anchors=num_anchors))
    ref2 = torch_ref(x2, weight, bias)
    assert out2.shape == (1, 13 * 13 * num_anchors, 10)
    assert jnp.allclose(out2, ref2, atol=1e-3, rtol=1e-3)

    # ---- bf16-activation path (halves the dominant HBM read; weights cast to
    #      bf16 intentionally, f32 accumulation) ----
    x_bf = x.astype(jnp.bfloat16)
    out_bf = jax.block_until_ready(landmark_head_forward(x_bf, weight, bias, num_anchors=num_anchors))
    ref_bf = (jnp.einsum("nchw,oc->nhwo", x_bf,
                         weight.reshape(CO, C).astype(jnp.bfloat16),
                         preferred_element_type=jnp.float32)
              + bias).reshape(N, H * W * num_anchors, 10)
    assert out_bf.dtype == jnp.bfloat16
    assert jnp.allclose(out_bf.astype(jnp.float32), ref_bf, atol=2e-2, rtol=2e-2)

    print("KERNEL_OK")
</pallas_src>

<mosaic_0001>
module attributes {stable_mosaic.version = 11 : i64} {
  func.func @_conv1x1_kernel_lane_padded(%arg0: i32, %arg1: i32, %arg2: memref<1x32x256xf32, #tpu.memory_space<vmem>>, %arg3: memref<30x32xf32, #tpu.memory_space<vmem>>, %arg4: memref<30x1xf32, #tpu.memory_space<vmem>>, %arg5: memref<1x256x30xf32, #tpu.memory_space<vmem>>) attributes {dimension_semantics = [#tpu.dimension_semantics<parallel>, #tpu.dimension_semantics<parallel>], iteration_bounds = array<i64: 2, 1>, scalar_prefetch = 0 : i64, scratch_operands = 0 : i64, tpu.core_type = #tpu.core_type<tc>, window_params = [{transform_indices = @transform_0, window_bounds = array<i64: 1, 32, 256>}, {pipeline_mode = #tpu.pipeline_mode<synchronous>, transform_indices = @transform_1, window_bounds = array<i64: 30, 32>}, {pipeline_mode = #tpu.pipeline_mode<synchronous>, transform_indices = @transform_2, window_bounds = array<i64: 30, 1>}, {transform_indices = @transform_3, window_bounds = array<i64: 1, 256, 30>}]} {
    %c0 = arith.constant 0 : index
    %c0_0 = arith.constant 0 : index
    %0 = vector.load %arg3[%c0, %c0_0] : memref<30x32xf32, #tpu.memory_space<vmem>>, vector<30x32xf32>
    %c0_1 = arith.constant 0 : index
    %c0_2 = arith.constant 0 : index
    %c0_3 = arith.constant 0 : index
    %1 = vector.load %arg2[%c0_1, %c0_2, %c0_3] : memref<1x32x256xf32, #tpu.memory_space<vmem>>, vector<1x32x256xf32>
    %2 = vector.shape_cast %1 : vector<1x32x256xf32> to vector<32x256xf32>
    %cst = arith.constant dense<0.000000e+00> : vector<30x256xf32>
    %3 = tpu.matmul %0, %2, %cst {dimension_numbers = #tpu.dot_dimension_numbers<[1], [0], [0], [1], [0, 0, 1, 1], [], []>} : vector<30x32xf32>, vector<32x256xf32>, vector<30x256xf32> -> vector<30x256xf32>
    %c0_4 = arith.constant 0 : index
    %c0_5 = arith.constant 0 : index
    %4 = vector.load %arg4[%c0_4, %c0_5] : memref<30x1xf32, #tpu.memory_space<vmem>>, vector<30x1xf32>
    %5 = vector.broadcast %4 : vector<30x1xf32> to vector<30x256xf32>
    %6 = arith.addf %3, %5 : vector<30x256xf32>
    %7 = tpu.transpose %6, [1, 0] : vector<30x256xf32> -> vector<256x30xf32>
    %c0_6 = arith.constant 0 : index
    %c0_7 = arith.constant 0 : index
    %c0_8 = arith.constant 0 : index
    %8 = vector.load %arg5[%c0_6, %c0_7, %c0_8] : memref<1x256x30xf32, #tpu.memory_space<vmem>>, vector<1x256x30xf32>
    %9 = vector.shape_cast %8 : vector<1x256x30xf32> to vector<256x30xf32>
    %10 = vector.shape_cast %7 : vector<256x30xf32> to vector<1x256x30xf32>
    tpu.vector_store %arg5[%c0_6, %c0_7, %c0_8], %10 {strides = array<i32>} : memref<1x256x30xf32, #tpu.memory_space<vmem>>, vector<1x256x30xf32>,
    return
  }
  func.func @transform_0(%arg0: i32, %arg1: i32) -> (i32, i32, i32) {
    %c0_i32 = arith.constant 0 : i32
    %c0_i32_0 = arith.constant 0 : i32
    return %arg0, %c0_i32, %arg1 : i32, i32, i32
  }
  func.func @transform_1(%arg0: i32, %arg1: i32) -> (i32, i32) {
    %c0_i32 = arith.constant 0 : i32
    %c0_i32_0 = arith.constant 0 : i32
    %c0_i32_1 = arith.constant 0 : i32
    return %c0_i32, %c0_i32_0 : i32, i32
  }
  func.func @transform_2(%arg0: i32, %arg1: i32) -> (i32, i32) {
    %c0_i32 = arith.constant 0 : i32
    %c0_i32_0 = arith.constant 0 : i32
    %c0_i32_1 = arith.constant 0 : i32
    return %c0_i32, %c0_i32_0 : i32, i32
  }
  func.func @transform_3(%arg0: i32, %arg1: i32) -> (i32, i32, i32) {
    %c0_i32 = arith.constant 0 : i32
    %c0_i32_0 = arith.constant 0 : i32
    return %arg0, %arg1, %c0_i32 : i32, i32, i32
  }
}

</mosaic_0001>

<bundles_post_ra>
// kernel: tpu_custom_call.1
= control target key start
LH: loop header
LB: loop body
LE: loop exit
PB: predicated region body
PF: predicated region fallthrough
CT: control target
= control target key end

     0   :  { %8 = vsyncpa [#allocation3], 0  ;;  %s903_s0 = inlined_call_operand.hbm [shape: f32[2,32,256], index: 0, kind: input, shape index: {}]   ;;  %s904_s1 = inlined_call_operand.vmem [shape: f32[30,32], index: 1, kind: input, shape index: {}]   ;;  %s905_s2 = inlined_call_operand.vmem [shape: f32[30,1], index: 2, kind: input, shape index: {}]   ;;  %s906_s3 = inlined_call_operand.vmem [shape: f32[2,256,30], index: 3, kind: output, shape index: {}]  }
   0x1   :  { %10 = vsyncpa [#allocation3 + $0x1], 0  ;;  %s717_s12 = smov 0   ;;  %s719_s13 = smov 0  }
   0x2   :  { %s721_s14 = smov 0   ;;  %s723_s15 = smov 0  }
   0x3   :  { %s725_s16 = smov 0   ;;  %s727_s17 = smov 0  }
   0x4 LB: > { %s520_s18 = sadd.s32 4294967295, %s692_s17   ;;  %s28_s19 = sadd.s32 1, %s688_s16  ;;  %s692_s17 = sphi %s727_s17, %s16_s17   ;;  %s688_s16 = sphi %s725_s16, %s913_s16   ;;  %s684_s15 = sphi %s723_s15, %s912_s15   ;;  %s680_s14 = sphi %s721_s14, %s911_s14   ;;  %s676_s13 = sphi %s719_s13, %s910_s13   ;;  %s672_s12 = sphi %s717_s12, %s909_s12  }
   0x5   : > { %p30_p0 = scmp.ge.s32.totalorder %s28_s19, 2  ;;  %s37_s20 = sadd.s32 1, %s680_s14 }
   0x6   : > { %p44_p1 = scmp.ne.s32.totalorder %s680_s14, %s676_s13  ;;  %p45_p2 = scmp.eq.s32.totalorder %s692_s17, 0 }
   0x7   : > { %s915_s19 = smov (%p30_p0, %s28_s19), 0  ;;  %p50_p4 = scmp.ne.s32.totalorder %s676_s13, %s672_s12 }
   0x8   : > { %p753_p3 = por %p45_p2, %p44_p1  ;;  %s32_s22 = ssub.s32 %s688_s16, %s915_s19 }
   0x9   : > { %p51_p5 = scmp.eq.s32.totalorder %s520_s18, 0  ;;  %p35_p6 = scmp.eq.s32.totalorder %s32_s22, 0 }
   0xa   : > { %p557_p8 = scmp.lt.s32.totalorder %s692_s17, 2  ;;  %s150_s25 = sand.u32 1, %s680_s14  }
   0xb   : > { %p760_p7 = por %p51_p5, %p50_p4  ;;  %s541_s26 = sshll.u32 %s688_s16, 6 }
   0xc   : > { %s766_s24 = scalar_select %p35_p6, %s680_s14, %s37_s20  }
   0xd   : > { %s524_s27 = sshll.u32 %s150_s25, 6  ;;  %s161_s30 = scalar_lea.hbm %s903_s0, %s541_s26 }
   0xe   : > { %s162_s4 = sshll.u32 %s161_s30, 4  ;;  %s154_s5 = scalar_lea.vmem [#allocation2], %s524_s27  ;;  %s163_s4 = int_to_ptr.hbm [resolvable:$true] %s162_s4 }
   0xf   : > { %s164_s6 = sshll.u32 %s154_s5, 4  ;;  %p554_p9 = pnand %p557_p8, %p753_p3  ;;  %s165_s6 = int_to_ptr.vmem [resolvable:$true] %s164_s6 }
  0x10   : > { %p527_p10 = scmp.ge.s32.totalorder %s692_s17, 1  ;;  %p172_p11 = scmp.lt.s32.totalorder %s692_s17, 3 }
  0x11   : > { %s151_s7 = scalar_lea.sflag [#allocation3], %s150_s25  ;;  %s694_s8 = smov 256  }
  0x12   : > { %s695_s9 = smov 16   ;;  %p173_p12 = pnand %p527_p10, %p172_p11 }
  0x13   : > { %556 = dma.hbm_to_vmem [thread:$0]  (!%p554_p9), %s163_s4, 1024, %s165_s6, %s151_s7, %s694_s8, %s694_s8, %s695_s9  }
  0x14   : > { %176 = sbr.rel (%p173_p12) target bundleno = 449 (0x1c1), region = 32  ;;  %s178_s10 = sand.u32 (!%p173_p12), 1, %s676_s13  }
  0x15   : > { %s528_s11 = sshll.u32 (!%p173_p12), %s178_s10, 6  ;;  %s179_s12 = scalar_lea.sflag (!%p173_p12), [#allocation3], %s178_s10 }
  0x16   : > { %s182_s18 = scalar_lea.vmem (!%p173_p12), [#allocation2], %s528_s11 }
  0x19   : > { %667 = dma.done.wait (%p760_p7), %s179_s12, 1024  }
  0x1a   : > { %669 = vsyncadd (%p760_p7), %s179_s12, 4294966272  ;;  %v696_v0 = vmov 0   ;;  %v231_v1 = vld [vmem:[%s182_s18 + $0x30] sm:$0xff]  ;;  %v232_v2 = vld [vmem:[%s182_s18 + $0x38] sm:$0xff]  ;;  %vm257_vm0 = vcmask 261120   ;;  %p212_p13 = scmp.lt.s32.totalorder %s684_s15, 1 }
  0x1b   : > { %610 = vset.pattern.permute.xlu0 %v696_v0  ;;  %611 = vset.pattern.permute.xlu1 %v696_v0  ;;  %v229_v3 = vld [vmem:[%s182_s18 + $0x20] sm:$0xff]  ;;  %v230_v4 = vld [vmem:[%s182_s18 + $0x28] sm:$0xff]  ;;  %v227_v5 = vld [vmem:[%s182_s18 + $0x10] sm:$0xff]  ;;  %vm392_vm1 = vcmask 244736  }
  0x1c   : > { %282 = vmatpush.msra.mxu0 %v231_v1  ;;  %311 = vmatpush.msra.mxu1 %v232_v2  ;;  %v228_v6 = vld [vmem:[%s182_s18 + $0x18] sm:$0xff]  ;;  %v225_v7 = vld [vmem:[%s182_s18] sm:$0xff]  ;;  %v226_v8 = vld [vmem:[%s182_s18 + $0x8] sm:$0xff]  ;;  %s917_s15 = smov (!%p212_p13, %s684_s15), 1 }
  0x1d   : > { %543 = vmatpush.msra.mxu2 %v231_v1  ;;  %547 = vmatpush.msra.mxu3 %v232_v2  ;;  %v221_v9 = vld [vmem:[%s904_s1] sm:$0xff]  ;;  %v223_v10 = vld [vmem:[%s904_s1 + $0x10] sm:$0xff]  ;;  %v222_v13 = vld [vmem:[%s904_s1 + $0x8] sm:$0xff]  ;;  %s542_s10 = sshll.u32 %s917_s15, 8 }
  0x1e   : > { %283 = vmatpush.msra.mxu0 %v229_v3  ;;  %312 = vmatpush.msra.mxu1 %v230_v4  ;;  %v233_v11 = vld [vmem:[%s905_s2] sm:$0xff]  ;;  %v235_v12 = vld [vmem:[%s905_s2 + $0x10] sm:$0xff]  ;;  %v224_v14 = vld [vmem:[%s904_s1 + $0x18] sm:$0x3f]  ;;  %s819_s18 = scalar_lea.vmem %s906_s3, %s542_s10 }
  0x1f   : > { %544 = vmatpush.msra.mxu2 %v229_v3  ;;  %548 = vmatpush.msra.mxu3 %v230_v4  ;;  %v234_v15 = vld [vmem:[%s905_s2 + $0x8] sm:$0xff]  ;;  %v236_v16 = vld [vmem:[%s905_s2 + $0x18] sm:$0x3f] }
  0x20   : > { %284 = vmatpush.msra.mxu0 %v227_v5  ;;  %313 = vmatpush.msra.mxu1 %v228_v6 }
  0x21   : > { %545 = vmatpush.msra.mxu2 %v227_v5  ;;  %549 = vmatpush.msra.mxu3 %v228_v6 }
  0x22   : > { %285 = vmatpush.msra.mxu0 %v225_v7  ;;  %314 = vmatpush.msra.mxu1 %v226_v8 }
  0x23   : > { %531 = vmatmul.msk.f32.vlgmr.msra.gmra.mxu0 %vm257_vm0, %v221_v9  ;;  %535 = vmatmul.msk.f32.vlgmr.msra.gmra.mxu1 %vm257_vm0, %v221_v9 }
  0x24   : > { %546 = vmatpush.msra.mxu2 %v225_v7  ;;  %550 = vmatpush.msra.mxu3 %v226_v8 }
  0x25   : > { %533 = vmatmul.msk.f32.vlgmr.msra.gmra.mxu2 %vm257_vm0, %v223_v10  ;;  %537 = vmatmul.msk.f32.vlgmr.msra.gmra.mxu3 %vm257_vm0, %v223_v10 }
  0x26   : > { %239 = vperm.xlu0 %610, %v233_v11   ;;  %249 = vperm.xlu1 %611, %v235_v12  }
  0x2b   : > { %532 = vmatmul.msk.f32.gmra.mxu0 %vm257_vm0, %v222_v13  ;;  %536 = vmatmul.msk.f32.gmra.mxu1 %vm257_vm0, %v222_v13 }
  0x2d   : > { %534 = vmatmul.msk.f32.gmra.mxu2 %vm257_vm0, %v224_v14  ;;  %538 = vmatmul.msk.f32.gmra.mxu3 %vm257_vm0, %v224_v14 }
  0x2e   : > { %244 = vperm.xlu0 %610, %v234_v15   ;;  %254 = vperm.xlu1 %611, %v236_v16  }
  0x98   : > { %v240_v17 = vpop.permute.xlu0 %239  ;;  %v250_v27 = vpop.permute.xlu1 %249 }
  0xa0   : > { %v287_v18 = vpop.f32.mrf.mxu0  ;;  %v316_v19 = vpop.f32.mrf.mxu1 }
  0xa1   : > { %v288_v20 = vadd.f32 %v287_v18, %v240_v17  ;;  %v317_v21 = vadd.f32 %v316_v19, %v240_v17  ;;  %v245_v22 = vpop.permute.xlu0 %244  ;;  %v255_v32 = vpop.permute.xlu1 %254 }
  0xa3   : > { %328 = vxpose.xlu2.b32.start [1/4] (short) %v288_v20, 128  ;;  %360 = vxpose.xlu0.b32.start [1/4] (short) %v317_v21, 128 }
  0xa8   : > { %v290_v23 = vpop.f32.mrf.mxu0  ;;  %v319_v25 = vpop.f32.mrf.mxu1 }
  0xa9   : > { %v291_v24 = vadd.f32 %v290_v23, %v245_v22  ;;  %v320_v26 = vadd.f32 %v319_v25, %v245_v22  ;;  %v293_v28 = vpop.f32.mrf.mxu2  ;;  %v322_v29 = vpop.f32.mrf.mxu3 }
  0xaa   : > { %v294_v30 = vadd.f32 %v293_v28, %v250_v27  ;;  %v323_v31 = vadd.f32 %v322_v29, %v250_v27 }
  0xab   : > { %329 = vxpose.xlu2.b32.cont [2/4] (short) %v291_v24, 128  ;;  %361 = vxpose.xlu0.b32.cont [2/4] (short) %v320_v26, 128 }
  0xb1   : > { %v296_v33 = vpop.f32.mrf.mxu2  ;;  %v325_v34 = vpop.f32.mrf.mxu3 }
  0xb2   : > { %v297_v35 = vadd.f32 %v296_v33, %v255_v32  ;;  %v326_v36 = vadd.f32 %v325_v34, %v255_v32 }
  0xb3   : > { %330 = vxpose.xlu2.b32.cont [3/4] (short) %v294_v30, 128  ;;  %362 = vxpose.xlu0.b32.cont [3/4] (short) %v323_v31, 128 }
  0xbb   : > { %331 = vxpose.xlu2.b32.end [4/4] (short) %v297_v35, 128  ;;  %363 = vxpose.xlu0.b32.end [4/4] (short) %v326_v36, 128 }
 0x13c   : > { %v344_v37 = vpop.trf.xlu2 }
 0x13d   : > { %393 = vst.msk [vmem:[%s819_s18] sm:$0xff] %vm392_vm1, %v344_v37 }
 0x144   : > { %v345_v38 = vpop.trf.xlu2 }
 0x145   : > { %394 = vst.msk [vmem:[%s819_s18 + $0x8] sm:$0xff] %vm392_vm1, %v345_v38 }
 0x147   : > { %v376_v39 = vpop.trf.xlu0 }
 0x148   : > { %409 = vst.msk [vmem:[%s819_s18 + $0x80] sm:$0xff] %vm392_vm1, %v376_v39 }
 0x14c   : > { %v346_v40 = vpop.trf.xlu2 }
 0x14d   : > { %395 = vst.msk [vmem:[%s819_s18 + $0x10] sm:$0xff] %vm392_vm1, %v346_v40 }
 0x14f   : > { %v377_v41 = vpop.trf.xlu0 }
 0x150   : > { %410 = vst.msk [vmem:[%s819_s18 + $0x88] sm:$0xff] %vm392_vm1, %v377_v41 }
 0x154   : > { %v347_v42 = vpop.trf.xlu2 }
 0x155   : > { %396 = vst.msk [vmem:[%s819_s18 + $0x18] sm:$0xff] %vm392_vm1, %v347_v42 }
 0x157   : > { %v378_v43 = vpop.trf.xlu0 }
 0x158   : > { %411 = vst.msk [vmem:[%s819_s18 + $0x90] sm:$0xff] %vm392_vm1, %v378_v43 }
 0x15c   : > { %v348_v44 = vpop.trf.xlu2 }
 0x15d   : > { %397 = vst.msk [vmem:[%s819_s18 + $0x20] sm:$0xff] %vm392_vm1, %v348_v44 }
 0x15f   : > { %v379_v45 = vpop.trf.xlu0 }
 0x160   : > { %412 = vst.msk [vmem:[%s819_s18 + $0x98] sm:$0xff] %vm392_vm1, %v379_v45 }
 0x164   : > { %v349_v46 = vpop.trf.xlu2 }
 0x165   : > { %398 = vst.msk [vmem:[%s819_s18 + $0x28] sm:$0xff] %vm392_vm1, %v349_v46 }
 0x167   : > { %v380_v47 = vpop.trf.xlu0 }
 0x168   : > { %413 = vst.msk [vmem:[%s819_s18 + $0xa0] sm:$0xff] %vm392_vm1, %v380_v47 }
 0x16c   : > { %v350_v48 = vpop.trf.xlu2 }
 0x16d   : > { %399 = vst.msk [vmem:[%s819_s18 + $0x30] sm:$0xff] %vm392_vm1, %v350_v48 }
 0x16f   : > { %v381_v49 = vpop.trf.xlu0 }
 0x170   : > { %414 = vst.msk [vmem:[%s819_s18 + $0xa8] sm:$0xff] %vm392_vm1, %v381_v49 }
 0x174   : > { %v351_v50 = vpop.trf.xlu2 }
 0x175   : > { %400 = vst.msk [vmem:[%s819_s18 + $0x38] sm:$0xff] %vm392_vm1, %v351_v50 }
 0x177   : > { %v382_v51 = vpop.trf.xlu0 }
 0x178   : > { %415 = vst.msk [vmem:[%s819_s18 + $0xb0] sm:$0xff] %vm392_vm1, %v382_v51 }
 0x17c   : > { %v352_v52 = vpop.trf.xlu2 }
 0x17d   : > { %401 = vst.msk [vmem:[%s819_s18 + $0x40] sm:$0xff] %vm392_vm1, %v352_v52 }
 0x17f   : > { %v383_v53 = vpop.trf.xlu0 }
 0x180   : > { %416 = vst.msk [vmem:[%s819_s18 + $0xb8] sm:$0xff] %vm392_vm1, %v383_v53 }
 0x184   : > { %v353_v54 = vpop.trf.xlu2 }
 0x185   : > { %402 = vst.msk [vmem:[%s819_s18 + $0x48] sm:$0xff] %vm392_vm1, %v353_v54 }
 0x187   : > { %v384_v55 = vpop.trf.xlu0 }
 0x188   : > { %417 = vst.msk [vmem:[%s819_s18 + $0xc0] sm:$0xff] %vm392_vm1, %v384_v55 }
 0x18c   : > { %v354_v56 = vpop.trf.xlu2 }
 0x18d   : > { %403 = vst.msk [vmem:[%s819_s18 + $0x50] sm:$0xff] %vm392_vm1, %v354_v56 }
 0x18f   : > { %v385_v57 = vpop.trf.xlu0 }
 0x190   : > { %418 = vst.msk [vmem:[%s819_s18 + $0xc8] sm:$0xff] %vm392_vm1, %v385_v57 }
 0x194   : > { %v355_v58 = vpop.trf.xlu2 }
 0x195   : > { %404 = vst.msk [vmem:[%s819_s18 + $0x58] sm:$0xff] %vm392_vm1, %v355_v58 }
 0x197   : > { %v386_v59 = vpop.trf.xlu0 }
 0x198   : > { %419 = vst.msk [vmem:[%s819_s18 + $0xd0] sm:$0xff] %vm392_vm1, %v386_v59 }
 0x19c   : > { %v356_v60 = vpop.trf.xlu2 }
 0x19d   : > { %405 = vst.msk [vmem:[%s819_s18 + $0x60] sm:$0xff] %vm392_vm1, %v356_v60 }
 0x19f   : > { %v387_v61 = vpop.trf.xlu0 }
 0x1a0   : > { %420 = vst.msk [vmem:[%s819_s18 + $0xd8] sm:$0xff] %vm392_vm1, %v387_v61 }
 0x1a4   : > { %v357_v62 = vpop.trf.xlu2 }
 0x1a5   : > { %406 = vst.msk [vmem:[%s819_s18 + $0x68] sm:$0xff] %vm392_vm1, %v357_v62 }
 0x1a7   : > { %v388_v63 = vpop.trf.xlu0 }
 0x1a8   : > { %421 = vst.msk [vmem:[%s819_s18 + $0xe0] sm:$0xff] %vm392_vm1, %v388_v63 }
 0x1ac   : > { %v358_v0 = vpop.trf.xlu2 }
 0x1ad   : > { %407 = vst.msk [vmem:[%s819_s18 + $0x70] sm:$0xff] %vm392_vm1, %v358_v0 }
 0x1af   : > { %v389_v1 = vpop.trf.xlu0 }
 0x1b0   : > { %422 = vst.msk [vmem:[%s819_s18 + $0xe8] sm:$0xff] %vm392_vm1, %v389_v1 }
 0x1b4   : > { %v359_v2 = vpop.trf.xlu2 }
 0x1b5   : > { %408 = vst.msk [vmem:[%s819_s18 + $0x78] sm:$0xff] %vm392_vm1, %v359_v2 }
 0x1b7   : > { %v390_v3 = vpop.trf.xlu0 }
 0x1b8   : > { %423 = vst.msk [vmem:[%s819_s18 + $0xf0] sm:$0xff] %vm392_vm1, %v390_v3 }
 0x1bf   : > { %v391_v4 = vpop.trf.xlu0 }
 0x1c0   : > { %424 = vst.msk [vmem:[%s819_s18 + $0xf8] sm:$0xff] %vm392_vm1, %v391_v4 }
 0x1c1 PF: > { %s16_s17 = sadd.s32 1, %s692_s17   ;;  %s909_s12 = smov %s676_s13 }
 0x1c2   : > { %p13_p0 = scmp.ge.s32.totalorder %s16_s17, 4   ;;  %s910_s13 = smov %s680_s14 }
 0x1c3   : > { %s911_s14 = smov %s766_s24  ;;  %s912_s15 = smov %s688_s16 }
 0x1c4   : > { %s913_s16 = smov %s915_s19  ;;  %15 = sbr.rel (!%p13_p0) target bundleno = 4 (0x4), region = 72 }
 0x1c9   :  { %455 = vsyncpa [#allocation3], 1 }
 0x1ca   :  { %457 = vsyncpa [#allocation3 + $0x1], 1 }

</bundles_post_ra>
